<compile_context>
chip_gen: v5e
topology: v5e:2x2
jax: 0.10.0
libtpu: 0.0.40
codegen_flags: <defaults>
</compile_context>

<pallas_src>
import functools

import jax
import jax.numpy as jnp
from jax.experimental import pallas as pl
from jax.experimental.pallas import tpu as pltpu

_LANES = 128
_SUBLANES = 8
# 3 * 4096 * 128 * 4 B = 6 MiB per block; x4 (double-buffered in + out) = 24 MiB.
_MAX_TILE_ROWS = 4096


def _periodic_kernel(x_ref, o_ref):
    # x_ref / o_ref: (3, TR, 128) float32.  Row i is state variable i; the batch
    # is packed densely on (sublane, lane).  Load each state row directly so
    # every VPU op works on full (TR, 128) tiles and every store is unmasked.
    x0 = x_ref[0]
    x1 = x_ref[1]
    x2 = x_ref[2]
    o_ref[0] = -9.913 * x0 + 9.913 * x1
    o_ref[1] = -7.175 * x0 + 20.507 * x1 - 0.613 * x1 * x2
    o_ref[2] = -3.05 * x2 + 0.504 * x0 * x0 + 0.479 * x1 * x1


def _round_up(n, m):
    return ((n + m - 1) // m) * m


def _pick_tile_rows(r, tile_rows):
    """Choose the block's second-minor (row) extent for a (3, R, 128) state."""
    tr = max(_SUBLANES, _round_up(int(tile_rows), _SUBLANES))  # 8-aligned
    tr = min(tr, _MAX_TILE_ROWS)                               # VMEM guard
    if r >= 2 * _SUBLANES:
        # Keep >=2 grid steps so ("parallel",) can use both v7x TensorCores.
        tr = min(tr, _round_up(pl.cdiv(r, 2), _SUBLANES))
    if tr >= r:
        tr = r  # single block spanning the full (possibly <8) row dim: legal
    return tr


def _dxdt_packed(xp, tile_rows):
    """Core pallas_call on packed state xp of shape (3, R, 128) float32."""
    three, r, lanes = xp.shape
    assert three == 3 and lanes == _LANES
    tr = _pick_tile_rows(r, tile_rows)
    grid = (pl.cdiv(r, tr),)  # ragged last block is fine (elementwise op)
    return pl.pallas_call(
        _periodic_kernel,
        out_shape=jax.ShapeDtypeStruct((3, r, _LANES), jnp.float32),
        grid=grid,
        in_specs=[pl.BlockSpec((3, tr, _LANES), lambda i: (0, i, 0))],
        out_specs=pl.BlockSpec((3, tr, _LANES), lambda i: (0, i, 0)),
        compiler_params=pltpu.CompilerParams(
            dimension_semantics=("parallel",)),
        cost_estimate=pl.CostEstimate(
            flops=16 * r * _LANES,                 # ~16 f32 ops per batch lane
            transcendentals=0,
            bytes_accessed=2 * 3 * r * _LANES * 4),  # read x + write dxdt
    )(xp)


@functools.partial(jax.jit, static_argnames=("tile_rows",))
def periodic_approx_dxdt_packed(x_packed, *, tile_rows=2048):
    """Zero-copy entry point: state already in (3, R, 128) float32 layout.

    Returns dxdt in the same (3, R, 128) layout.  Use this from an integrator
    that keeps its state packed end-to-end (no wrapper transposes/pads)."""
    return _dxdt_packed(x_packed.astype(jnp.float32), tile_rows)


@functools.partial(jax.jit, static_argnames=("tile_rows",))
def periodic_approx_forward(t, x, *, tile_rows=2048):
    """Pallas implementation of PeriodicApprox.forward(t, x).

    x: (B, 3) float32 state.  Returns dxdt of shape (B, 3) float32.
    t is unused (matches the PyTorch module)."""
    del t  # module ignores time
    B, F = x.shape
    assert F == 3, "PeriodicApprox models a 3-state system"
    x = x.astype(jnp.float32)

    # Layout plumbing only (outside the kernel): (B,3) -> (3, R, 128) packed.
    # An integrator should use periodic_approx_dxdt_packed() to avoid these
    # extra HBM passes entirely.
    b_pad = _round_up(max(B, 1), _LANES)   # pad only to the 128-lane row width
    xt = x.T                               # (3, B)
    if b_pad != B:
        xt = jnp.pad(xt, ((0, 0), (0, b_pad - B)))
    xp = xt.reshape(3, b_pad // _LANES, _LANES)

    out_p = _dxdt_packed(xp, tile_rows)

    # Back to the PyTorch (B, 3) layout.
    return out_p.reshape(3, b_pad)[:, :B].T


def _ref_forward(t, x):
    """Pure-JAX reference mirroring the PyTorch module."""
    del t
    x = x.astype(jnp.float32)
    x0, x1, x2 = x[:, 0], x[:, 1], x[:, 2]
    d0 = -9.913 * x0 + 9.913 * x1
    d1 = -7.175 * x0 + 20.507 * x1 - 0.613 * x1 * x2
    d2 = -3.05 * x2 + 0.504 * x0 ** 2 + 0.479 * x1 ** 2
    return jnp.stack([d0, d1, d2], axis=1)


if __name__ == "__main__":
    key = jax.random.PRNGKey(0)
    k1, k2, k3 = jax.random.split(key, 3)
    t = jnp.float32(0.5)

    # Small shape consistent with the module: batch=8, state dim=3 (grid of 1,
    # full-row block, pad-to-128 path).
    x = jax.random.normal(k1, (8, 3), dtype=jnp.float32)
    y = jax.block_until_ready(periodic_approx_forward(t, x))
    y_ref = _ref_forward(t, x)
    assert y.shape == (8, 3)
    assert jnp.allclose(y, y_ref, atol=1e-5, rtol=1e-5)

    # Multi-step grid with a ragged last block: B=3000 -> R=24 rows, TR=16,
    # grid=(2,), second block covers only 8 live rows.
    x_big = jax.random.normal(k2, (3000, 3), dtype=jnp.float32)
    y_big = jax.block_until_ready(
        periodic_approx_forward(t, x_big, tile_rows=16))
    y_big_ref = _ref_forward(t, x_big)
    assert y_big.shape == (3000, 3)
    assert jnp.allclose(y_big, y_big_ref, atol=1e-5, rtol=1e-5)

    # Zero-copy packed-layout entry point (what an integrator should call).
    xp = jax.random.normal(k3, (3, 8, 128), dtype=jnp.float32)
    yp = jax.block_until_ready(periodic_approx_dxdt_packed(xp))
    yp_ref = _ref_forward(t, xp.reshape(3, -1).T).T.reshape(3, 8, 128)
    assert yp.shape == (3, 8, 128)
    assert jnp.allclose(yp, yp_ref, atol=1e-5, rtol=1e-5)

    print("KERNEL_OK")
</pallas_src>

<mosaic_0001>
module attributes {stable_mosaic.version = 11 : i64} {
  func.func @_periodic_kernel(%arg0: i32, %arg1: memref<3x1x128xf32, #tpu.memory_space<vmem>>, %arg2: memref<3x1x128xf32, #tpu.memory_space<vmem>>) attributes {dimension_semantics = [#tpu.dimension_semantics<parallel>], iteration_bounds = array<i64: 1>, scalar_prefetch = 0 : i64, scratch_operands = 0 : i64, tpu.core_type = #tpu.core_type<tc>, window_params = [{transform_indices = @transform_0, window_bounds = array<i64: 3, 1, 128>}, {transform_indices = @transform_1, window_bounds = array<i64: 3, 1, 128>}]} {
    %c0 = arith.constant 0 : index
    %c0_0 = arith.constant 0 : index
    %c0_1 = arith.constant 0 : index
    %0 = vector.load %arg1[%c0, %c0_0, %c0_1] : memref<3x1x128xf32, #tpu.memory_space<vmem>>, vector<1x1x128xf32>
    %1 = vector.shape_cast %0 : vector<1x1x128xf32> to vector<1x128xf32>
    %c1 = arith.constant 1 : index
    %c0_2 = arith.constant 0 : index
    %c0_3 = arith.constant 0 : index
    %2 = vector.load %arg1[%c1, %c0_2, %c0_3] : memref<3x1x128xf32, #tpu.memory_space<vmem>>, vector<1x1x128xf32>
    %3 = vector.shape_cast %2 : vector<1x1x128xf32> to vector<1x128xf32>
    %c2 = arith.constant 2 : index
    %c0_4 = arith.constant 0 : index
    %c0_5 = arith.constant 0 : index
    %4 = vector.load %arg1[%c2, %c0_4, %c0_5] : memref<3x1x128xf32, #tpu.memory_space<vmem>>, vector<1x1x128xf32>
    %5 = vector.shape_cast %4 : vector<1x1x128xf32> to vector<1x128xf32>
    %cst = arith.constant -9.913000e+00 : f32
    %6 = vector.broadcast %cst : f32 to vector<1x128xf32>
    %7 = arith.mulf %6, %1 : vector<1x128xf32>
    %cst_6 = arith.constant 9.913000e+00 : f32
    %8 = vector.broadcast %cst_6 : f32 to vector<1x128xf32>
    %9 = arith.mulf %8, %3 : vector<1x128xf32>
    %10 = arith.addf %7, %9 : vector<1x128xf32>
    %c0_7 = arith.constant 0 : index
    %c0_8 = arith.constant 0 : index
    %c0_9 = arith.constant 0 : index
    %11 = vector.load %arg2[%c0_7, %c0_8, %c0_9] : memref<3x1x128xf32, #tpu.memory_space<vmem>>, vector<1x1x128xf32>
    %12 = vector.shape_cast %11 : vector<1x1x128xf32> to vector<1x128xf32>
    %13 = vector.shape_cast %10 : vector<1x128xf32> to vector<1x1x128xf32>
    tpu.vector_store %arg2[%c0_7, %c0_8, %c0_9], %13 {strides = array<i32>} : memref<3x1x128xf32, #tpu.memory_space<vmem>>, vector<1x1x128xf32>,
    %cst_10 = arith.constant -7.175000e+00 : f32
    %14 = vector.broadcast %cst_10 : f32 to vector<1x128xf32>
    %15 = arith.mulf %14, %1 : vector<1x128xf32>
    %cst_11 = arith.constant 2.050700e+01 : f32
    %16 = vector.broadcast %cst_11 : f32 to vector<1x128xf32>
    %17 = arith.mulf %16, %3 : vector<1x128xf32>
    %18 = arith.addf %15, %17 : vector<1x128xf32>
    %cst_12 = arith.constant 0.612999975 : f32
    %19 = vector.broadcast %cst_12 : f32 to vector<1x128xf32>
    %20 = arith.mulf %19, %3 : vector<1x128xf32>
    %21 = arith.mulf %20, %5 : vector<1x128xf32>
    %22 = arith.subf %18, %21 : vector<1x128xf32>
    %c1_13 = arith.constant 1 : index
    %c0_14 = arith.constant 0 : index
    %c0_15 = arith.constant 0 : index
    %23 = vector.load %arg2[%c1_13, %c0_14, %c0_15] : memref<3x1x128xf32, #tpu.memory_space<vmem>>, vector<1x1x128xf32>
    %24 = vector.shape_cast %23 : vector<1x1x128xf32> to vector<1x128xf32>
    %25 = vector.shape_cast %22 : vector<1x128xf32> to vector<1x1x128xf32>
    tpu.vector_store %arg2[%c1_13, %c0_14, %c0_15], %25 {strides = array<i32>} : memref<3x1x128xf32, #tpu.memory_space<vmem>>, vector<1x1x128xf32>,
    %cst_16 = arith.constant -3.050000e+00 : f32
    %26 = vector.broadcast %cst_16 : f32 to vector<1x128xf32>
    %27 = arith.mulf %26, %5 : vector<1x128xf32>
    %cst_17 = arith.constant 5.040000e-01 : f32
    %28 = vector.broadcast %cst_17 : f32 to vector<1x128xf32>
    %29 = arith.mulf %28, %1 : vector<1x128xf32>
    %30 = arith.mulf %29, %1 : vector<1x128xf32>
    %31 = arith.addf %27, %30 : vector<1x128xf32>
    %cst_18 = arith.constant 4.790000e-01 : f32
    %32 = vector.broadcast %cst_18 : f32 to vector<1x128xf32>
    %33 = arith.mulf %32, %3 : vector<1x128xf32>
    %34 = arith.mulf %33, %3 : vector<1x128xf32>
    %35 = arith.addf %31, %34 : vector<1x128xf32>
    %c2_19 = arith.constant 2 : index
    %c0_20 = arith.constant 0 : index
    %c0_21 = arith.constant 0 : index
    %36 = vector.load %arg2[%c2_19, %c0_20, %c0_21] : memref<3x1x128xf32, #tpu.memory_space<vmem>>, vector<1x1x128xf32>
    %37 = vector.shape_cast %36 : vector<1x1x128xf32> to vector<1x128xf32>
    %38 = vector.shape_cast %35 : vector<1x128xf32> to vector<1x1x128xf32>
    tpu.vector_store %arg2[%c2_19, %c0_20, %c0_21], %38 {strides = array<i32>} : memref<3x1x128xf32, #tpu.memory_space<vmem>>, vector<1x1x128xf32>,
    return
  }
  func.func @transform_0(%arg0: i32) -> (i32, i32, i32) {
    %c0_i32 = arith.constant 0 : i32
    %c0_i32_0 = arith.constant 0 : i32
    %c0_i32_1 = arith.constant 0 : i32
    return %c0_i32, %arg0, %c0_i32_0 : i32, i32, i32
  }
  func.func @transform_1(%arg0: i32) -> (i32, i32, i32) {
    %c0_i32 = arith.constant 0 : i32
    %c0_i32_0 = arith.constant 0 : i32
    %c0_i32_1 = arith.constant 0 : i32
    return %c0_i32, %arg0, %c0_i32_0 : i32, i32, i32
  }
}

</mosaic_0001>

<bundles_post_ra>
// kernel: periodic_approx_forward.1
= control target key start
LH: loop header
LB: loop body
LE: loop exit
PB: predicated region body
PF: predicated region fallthrough
CT: control target
= control target key end

     0   :  { %s70_s0 = inlined_call_operand.vmem [shape: f32[3,1,128], index: 0, kind: input, shape index: {}]   ;;  %s71_s1 = inlined_call_operand.vmem [shape: f32[3,1,128], index: 1, kind: output, shape index: {}]  }
   0x1   :  { %v8_v0 = vld [vmem:[%s70_s0] sm:$0x1]  ;;  %v38_v1 = vld [vmem:[%s70_s0 + $0x1] sm:$0x1]  ;;  %v39_v2 = vld [vmem:[%s70_s0 + $0x2] sm:$0x1] }
   0x2   :  { %v13_v3 = vmul.f32 -9.913, %v8_v0  ;;  %v14_v4 = vmul.f32 9.913, %v38_v1  ;;  %v17_v5 = vmul.f32 -7.175, %v8_v0 }
   0x3   :  { %v18_v6 = vmul.f32 20.507, %v38_v1  ;;  %v20_v7 = vmul.f32 0.613, %v38_v1  ;;  %v25_v9 = vmul.f32 -3.05, %v39_v2 }
   0x4   :  { %v15_v8 = vadd.f32 %v14_v4, %v13_v3  ;;  %v26_v10 = vmul.f32 0.504, %v8_v0  ;;  %v29_v11 = vmul.f32 0.479, %v38_v1 }
   0x5   :  { %v19_v12 = vadd.f32 %v18_v6, %v17_v5  ;;  %v21_v13 = vmul.f32 %v39_v2, %v20_v7 }
   0x6   :  { %16 = vst [vmem:[%s71_s1] sm:$0x1] %v15_v8  ;;  %v27_v14 = vmul.f32 %v26_v10, %v8_v0  ;;  %v30_v15 = vmul.f32 %v38_v1, %v29_v11 }
   0x7   :  { %v22_v16 = vsub.f32 %v19_v12, %v21_v13 }
   0x8   :  { %v28_v17 = vadd.f32 %v27_v14, %v25_v9 }
   0x9   :  { %40 = vst [vmem:[%s71_s1 + $0x1] sm:$0x1] %v22_v16 }
   0xa   :  { %v31_v18 = vadd.f32 %v30_v15, %v28_v17 }
   0xc   :  { %41 = vst [vmem:[%s71_s1 + $0x2] sm:$0x1] %v31_v18 }

</bundles_post_ra>
